<compile_context>
chip_gen: v5e
topology: v5e:2x2
jax: 0.10.0
libtpu: 0.0.40
codegen_flags: <defaults>
</compile_context>

<pallas_src>
import functools
import math

import jax
import jax.numpy as jnp
from jax.experimental import pallas as pl
from jax.experimental.pallas import tpu as pltpu


def _sigmoid_eup(x):
    # exp on the EUP + approximate reciprocal (also EUP); avoids a VPU divide.
    return pl.reciprocal(1.0 + jnp.exp(-x), approx=True)


def _gate_kernel(fwd_ref, bwd_ref,
                 wg_f_ref, wg_b_ref, bg_ref,
                 wfu_f_ref, wfu_b_ref, bfu_ref,
                 out_ref, *, hidden_dim):
    """One row-tile of the BiLSTM gate controller.

    fwd_ref / bwd_ref     : [tm, H]   activations (caller dtype)
    wg_f_ref / wg_b_ref   : [H, 2H]   fused fwd+bwd gate weight (bf16), split along K
    bg_ref                : [1, 2H]   fused gate bias = [bf | bb] (f32)
    wfu_f_ref / wfu_b_ref : [H, 2H]   fusion gate weight (bf16), split along K
    bfu_ref               : [1, 2H]   fusion gate bias (f32)
    out_ref               : [tm, 2H]
    """
    H = hidden_dim
    mxu_dtype = wg_f_ref.dtype

    fwd = fwd_ref[...]
    bwd = bwd_ref[...]
    fwd_f32 = fwd.astype(jnp.float32)
    bwd_f32 = bwd.astype(jnp.float32)

    # Fused forward/backward gate logits: cat([f, b]) @ [Wf | Wb] + [bf | bb],
    # expressed as a split-K contraction (no in-kernel concatenate).
    g_logit = (jnp.dot(fwd.astype(mxu_dtype), wg_f_ref[...],
                       preferred_element_type=jnp.float32)
               + jnp.dot(bwd.astype(mxu_dtype), wg_b_ref[...],
                         preferred_element_type=jnp.float32)
               + bg_ref[...])                              # [tm, 2H] f32
    gates = _sigmoid_eup(g_logit)

    gf = fwd_f32 * gates[:, :H]                            # gated forward  [tm, H]
    gb = bwd_f32 * gates[:, H:]                            # gated backward [tm, H]

    # Fusion gate on cat([gf, gb]) — again via split-K matmuls.
    fu_logit = (jnp.dot(gf.astype(mxu_dtype), wfu_f_ref[...],
                        preferred_element_type=jnp.float32)
                + jnp.dot(gb.astype(mxu_dtype), wfu_b_ref[...],
                          preferred_element_type=jnp.float32)
                + bfu_ref[...])                            # [tm, 2H] f32
    fusion = _sigmoid_eup(fu_logit)

    # Output = cat([gf, gb]) * fusion, written as two half-lane stores.
    # (Full-lane writes when H % 128 == 0; masked stores at tiny demo H.)
    out_ref[:, :H] = (gf * fusion[:, :H]).astype(out_ref.dtype)
    out_ref[:, H:] = (gb * fusion[:, H:]).astype(out_ref.dtype)


def _round_up(x, m):
    return ((x + m - 1) // m) * m


def bilstm_gate_controller(forward_features, backward_features, params, *,
                           tm=512, mxu_dtype=jnp.bfloat16,
                           vmem_budget_bytes=40 * 1024 * 1024):
    """forward_features / backward_features: [B, S, H] -> [B, S, 2H]."""
    B, S, H = forward_features.shape
    M = B * S
    out_dtype = forward_features.dtype

    # --- trace-time weight fusion / splitting (one-time, tiny) --------------
    # Fuse the two H-wide gate Linears into one 2H-wide one, then split every
    # weight along K so the kernel never concatenates activations.  Weights go
    # to bf16 for the MXU; biases stay f32 (added post-accumulation).
    wg = jnp.concatenate([params["wf"], params["wb"]], axis=1)        # [2H, 2H]
    bg = jnp.concatenate([params["bf"], params["bb"]], axis=1)        # [1, 2H]
    wg_f = wg[:H].astype(mxu_dtype)                                   # [H, 2H]
    wg_b = wg[H:].astype(mxu_dtype)                                   # [H, 2H]
    wfu_f = params["wfu"][:H].astype(mxu_dtype)                       # [H, 2H]
    wfu_b = params["wfu"][H:].astype(mxu_dtype)                       # [H, 2H]
    bg = bg.astype(jnp.float32)
    bfu = params["bfu"].astype(jnp.float32)                           # [1, 2H]

    fwd2d = forward_features.reshape(M, H)
    bwd2d = backward_features.reshape(M, H)

    # --- row tiling ----------------------------------------------------------
    itemsize_in = jnp.dtype(forward_features.dtype).itemsize
    itemsize_out = jnp.dtype(out_dtype).itemsize
    itemsize_w = jnp.dtype(mxu_dtype).itemsize

    tm = max(8, min(tm, _round_up(M, 8)))        # don't over-tile tiny inputs
    if M >= 16:                                  # v7x: >= 2 grid steps so both TCs get work
        tm = min(tm, _round_up(pl.cdiv(M, 2), 8))

    def vmem_estimate(tm_):
        acts = 2 * (2 * tm_ * H) * itemsize_in        # fwd + bwd, double-buffered
        outs = 2 * (tm_ * 2 * H) * itemsize_out       # out, double-buffered
        wts = (4 * H * 2 * H) * itemsize_w            # weights (single-buffered)
        biases = 2 * (2 * H) * 4
        temps = 8 * tm_ * 2 * H * 4                   # rough in-kernel f32 temporaries
        return acts + outs + wts + biases + temps

    while tm > 8 and vmem_estimate(tm) > vmem_budget_bytes:
        tm = max(8, _round_up(tm // 2, 8))

    grid = (pl.cdiv(M, tm),)                     # partial last block handled by Pallas
    vmem_limit = int(min(64 * 1024 * 1024,
                         max(32 * 1024 * 1024, 2 * vmem_estimate(tm))))

    cost = pl.CostEstimate(
        flops=16 * M * H * H,                    # four [.,H]x[H,2H] matmuls
        transcendentals=4 * M * H,               # two sigmoids over 2H columns
        bytes_accessed=int(2 * M * H * itemsize_in + M * 2 * H * itemsize_out
                           + 4 * H * 2 * H * itemsize_w + 2 * 2 * H * 4),
    )

    kernel = functools.partial(_gate_kernel, hidden_dim=H)

    def make_call(single_buffer_weights):
        w_kwargs = ({"pipeline_mode": pl.Buffered(1)}
                    if single_buffer_weights else {})
        row_spec = pl.BlockSpec((tm, H), lambda i: (i, 0))
        w_spec = pl.BlockSpec((H, 2 * H), lambda i: (0, 0), **w_kwargs)
        b_spec = pl.BlockSpec((1, 2 * H), lambda i: (0, 0), **w_kwargs)
        out_spec = pl.BlockSpec((tm, 2 * H), lambda i: (i, 0))
        return pl.pallas_call(
            kernel,
            out_shape=jax.ShapeDtypeStruct((M, 2 * H), out_dtype),
            grid_spec=pltpu.PrefetchScalarGridSpec(
                num_scalar_prefetch=0,
                grid=grid,
                in_specs=[row_spec, row_spec,
                          w_spec, w_spec, b_spec,
                          w_spec, w_spec, b_spec],
                out_specs=out_spec,
            ),
            compiler_params=pltpu.CompilerParams(
                dimension_semantics=("parallel",),   # shards row tiles across TCs on v7x
                vmem_limit_bytes=vmem_limit,
            ),
            cost_estimate=cost,
        )

    args = (fwd2d, bwd2d, wg_f, wg_b, bg, wfu_f, wfu_b, bfu)
    try:
        # Weights/biases have a constant index_map -> single-buffer them to
        # halve their VMEM footprint (matters at large H, especially on v7x).
        out2d = make_call(single_buffer_weights=True)(*args)
    except Exception:
        # TODO(synk): this JAX build rejects pipeline_mode=pl.Buffered(1) on a
        # top-level pallas_call; fall back to default double buffering.
        out2d = make_call(single_buffer_weights=False)(*args)

    return out2d.reshape(B, S, 2 * H)


def init_params(key, hidden_dim):
    """Deterministic init mirroring nn.Linear default (uniform +-1/sqrt(fan_in)).
    Weights are stored transposed: [in_features, out_features]."""
    h2 = 2 * hidden_dim
    bound = 1.0 / math.sqrt(h2)
    ks = jax.random.split(key, 6)
    u = lambda k, shape: jax.random.uniform(k, shape, jnp.float32, -bound, bound)
    return {
        "wf": u(ks[0], (h2, hidden_dim)),
        "bf": u(ks[1], (1, hidden_dim)),
        "wb": u(ks[2], (h2, hidden_dim)),
        "bb": u(ks[3], (1, hidden_dim)),
        "wfu": u(ks[4], (h2, h2)),
        "bfu": u(ks[5], (1, h2)),
    }


def _reference(forward_features, backward_features, params):
    """Plain-JAX f32 reference of the PyTorch forward (for sanity check)."""
    combined = jnp.concatenate([forward_features, backward_features], axis=-1)
    f_gate = jax.nn.sigmoid(combined @ params["wf"] + params["bf"][0])
    b_gate = jax.nn.sigmoid(combined @ params["wb"] + params["bb"][0])
    gated = jnp.concatenate(
        [forward_features * f_gate, backward_features * b_gate], axis=-1)
    fusion = jax.nn.sigmoid(gated @ params["wfu"] + params["bfu"][0])
    return gated * fusion


if __name__ == "__main__":
    B, S, H = 2, 8, 32  # batch, seq, hidden

    key = jax.random.PRNGKey(0)
    k_fwd, k_bwd, k_params = jax.random.split(key, 3)

    forward_features = jax.random.normal(k_fwd, (B, S, H), jnp.float32)
    backward_features = jax.random.normal(k_bwd, (B, S, H), jnp.float32)
    params = init_params(k_params, H)

    out = bilstm_gate_controller(forward_features, backward_features, params)
    out = jax.block_until_ready(out)

    ref = _reference(forward_features, backward_features, params)
    assert out.shape == (B, S, 2 * H)
    # bf16 MXU operands + EUP approx reciprocal -> relaxed tolerance vs f32 ref.
    err = float(jnp.max(jnp.abs(out - ref)))
    assert jnp.allclose(out, ref, atol=3e-2, rtol=3e-2), err

    print("KERNEL_OK")
</pallas_src>

<mosaic_0001>
module attributes {stable_mosaic.version = 11 : i64} {
  func.func @_gate_kernel(%arg0: i32, %arg1: memref<8x32xf32, #tpu.memory_space<vmem>>, %arg2: memref<8x32xf32, #tpu.memory_space<vmem>>, %arg3: memref<32x64xbf16, #tpu.memory_space<vmem>>, %arg4: memref<32x64xbf16, #tpu.memory_space<vmem>>, %arg5: memref<1x64xf32, #tpu.memory_space<vmem>>, %arg6: memref<32x64xbf16, #tpu.memory_space<vmem>>, %arg7: memref<32x64xbf16, #tpu.memory_space<vmem>>, %arg8: memref<1x64xf32, #tpu.memory_space<vmem>>, %arg9: memref<8x64xf32, #tpu.memory_space<vmem>>) attributes {dimension_semantics = [#tpu.dimension_semantics<parallel>], iteration_bounds = array<i64: 2>, scalar_prefetch = 0 : i64, scratch_operands = 0 : i64, tpu.core_type = #tpu.core_type<tc>, window_params = [{transform_indices = @transform_0, window_bounds = array<i64: 8, 32>}, {transform_indices = @transform_1, window_bounds = array<i64: 8, 32>}, {pipeline_mode = #tpu.pipeline_mode<synchronous>, transform_indices = @transform_2, window_bounds = array<i64: 32, 64>}, {pipeline_mode = #tpu.pipeline_mode<synchronous>, transform_indices = @transform_3, window_bounds = array<i64: 32, 64>}, {pipeline_mode = #tpu.pipeline_mode<synchronous>, transform_indices = @transform_4, window_bounds = array<i64: 1, 64>}, {pipeline_mode = #tpu.pipeline_mode<synchronous>, transform_indices = @transform_5, window_bounds = array<i64: 32, 64>}, {pipeline_mode = #tpu.pipeline_mode<synchronous>, transform_indices = @transform_6, window_bounds = array<i64: 32, 64>}, {pipeline_mode = #tpu.pipeline_mode<synchronous>, transform_indices = @transform_7, window_bounds = array<i64: 1, 64>}, {transform_indices = @transform_8, window_bounds = array<i64: 8, 64>}]} {
    %c0 = arith.constant 0 : index
    %c0_0 = arith.constant 0 : index
    %0 = vector.load %arg1[%c0, %c0_0] : memref<8x32xf32, #tpu.memory_space<vmem>>, vector<8x32xf32>
    %c0_1 = arith.constant 0 : index
    %c0_2 = arith.constant 0 : index
    %1 = vector.load %arg2[%c0_1, %c0_2] : memref<8x32xf32, #tpu.memory_space<vmem>>, vector<8x32xf32>
    %2 = arith.truncf %0 : vector<8x32xf32> to vector<8x32xbf16>
    %c0_3 = arith.constant 0 : index
    %c0_4 = arith.constant 0 : index
    %3 = vector.load %arg3[%c0_3, %c0_4] : memref<32x64xbf16, #tpu.memory_space<vmem>>, vector<32x64xbf16>
    %cst = arith.constant dense<0.000000e+00> : vector<8x64xf32>
    %4 = tpu.matmul %2, %3, %cst {dimension_numbers = #tpu.dot_dimension_numbers<[1], [0], [0], [1], [0, 0, 1, 1], [], []>} : vector<8x32xbf16>, vector<32x64xbf16>, vector<8x64xf32> -> vector<8x64xf32>
    %5 = arith.truncf %1 : vector<8x32xf32> to vector<8x32xbf16>
    %c0_5 = arith.constant 0 : index
    %c0_6 = arith.constant 0 : index
    %6 = vector.load %arg4[%c0_5, %c0_6] : memref<32x64xbf16, #tpu.memory_space<vmem>>, vector<32x64xbf16>
    %cst_7 = arith.constant dense<0.000000e+00> : vector<8x64xf32>
    %7 = tpu.matmul %5, %6, %cst_7 {dimension_numbers = #tpu.dot_dimension_numbers<[1], [0], [0], [1], [0, 0, 1, 1], [], []>} : vector<8x32xbf16>, vector<32x64xbf16>, vector<8x64xf32> -> vector<8x64xf32>
    %8 = arith.addf %4, %7 : vector<8x64xf32>
    %c0_8 = arith.constant 0 : index
    %c0_9 = arith.constant 0 : index
    %9 = vector.load %arg5[%c0_8, %c0_9] : memref<1x64xf32, #tpu.memory_space<vmem>>, vector<1x64xf32>
    %10 = vector.broadcast %9 : vector<1x64xf32> to vector<8x64xf32>
    %11 = arith.addf %8, %10 : vector<8x64xf32>
    %cst_10 = arith.constant 0.000000e+00 : f32
    %12 = vector.broadcast %cst_10 : f32 to vector<8x64xf32>
    %13 = arith.subf %12, %11 : vector<8x64xf32>
    %14 = math.exp %13 : vector<8x64xf32>
    %cst_11 = arith.constant 1.000000e+00 : f32
    %15 = vector.broadcast %cst_11 : f32 to vector<8x64xf32>
    %16 = arith.addf %15, %14 : vector<8x64xf32>
    %17 = tpu.reciprocal %16 {approx = true} : vector<8x64xf32> -> vector<8x64xf32>
    %18 = vector.extract_strided_slice %17 {offsets = [0, 0], sizes = [8, 32], strides = [1, 1]} : vector<8x64xf32> to vector<8x32xf32>
    %19 = arith.mulf %0, %18 : vector<8x32xf32>
    %20 = vector.extract_strided_slice %17 {offsets = [0, 32], sizes = [8, 32], strides = [1, 1]} : vector<8x64xf32> to vector<8x32xf32>
    %21 = arith.mulf %1, %20 : vector<8x32xf32>
    %22 = arith.truncf %19 : vector<8x32xf32> to vector<8x32xbf16>
    %c0_12 = arith.constant 0 : index
    %c0_13 = arith.constant 0 : index
    %23 = vector.load %arg6[%c0_12, %c0_13] : memref<32x64xbf16, #tpu.memory_space<vmem>>, vector<32x64xbf16>
    %cst_14 = arith.constant dense<0.000000e+00> : vector<8x64xf32>
    %24 = tpu.matmul %22, %23, %cst_14 {dimension_numbers = #tpu.dot_dimension_numbers<[1], [0], [0], [1], [0, 0, 1, 1], [], []>} : vector<8x32xbf16>, vector<32x64xbf16>, vector<8x64xf32> -> vector<8x64xf32>
    %25 = arith.truncf %21 : vector<8x32xf32> to vector<8x32xbf16>
    %c0_15 = arith.constant 0 : index
    %c0_16 = arith.constant 0 : index
    %26 = vector.load %arg7[%c0_15, %c0_16] : memref<32x64xbf16, #tpu.memory_space<vmem>>, vector<32x64xbf16>
    %cst_17 = arith.constant dense<0.000000e+00> : vector<8x64xf32>
    %27 = tpu.matmul %25, %26, %cst_17 {dimension_numbers = #tpu.dot_dimension_numbers<[1], [0], [0], [1], [0, 0, 1, 1], [], []>} : vector<8x32xbf16>, vector<32x64xbf16>, vector<8x64xf32> -> vector<8x64xf32>
    %28 = arith.addf %24, %27 : vector<8x64xf32>
    %c0_18 = arith.constant 0 : index
    %c0_19 = arith.constant 0 : index
    %29 = vector.load %arg8[%c0_18, %c0_19] : memref<1x64xf32, #tpu.memory_space<vmem>>, vector<1x64xf32>
    %30 = vector.broadcast %29 : vector<1x64xf32> to vector<8x64xf32>
    %31 = arith.addf %28, %30 : vector<8x64xf32>
    %cst_20 = arith.constant 0.000000e+00 : f32
    %32 = vector.broadcast %cst_20 : f32 to vector<8x64xf32>
    %33 = arith.subf %32, %31 : vector<8x64xf32>
    %34 = math.exp %33 : vector<8x64xf32>
    %cst_21 = arith.constant 1.000000e+00 : f32
    %35 = vector.broadcast %cst_21 : f32 to vector<8x64xf32>
    %36 = arith.addf %35, %34 : vector<8x64xf32>
    %37 = tpu.reciprocal %36 {approx = true} : vector<8x64xf32> -> vector<8x64xf32>
    %38 = vector.extract_strided_slice %37 {offsets = [0, 0], sizes = [8, 32], strides = [1, 1]} : vector<8x64xf32> to vector<8x32xf32>
    %39 = arith.mulf %19, %38 : vector<8x32xf32>
    %c0_22 = arith.constant 0 : index
    %c0_23 = arith.constant 0 : index
    %40 = vector.load %arg9[%c0_22, %c0_23] : memref<8x64xf32, #tpu.memory_space<vmem>>, vector<8x32xf32>
    tpu.vector_store %arg9[%c0_22, %c0_23], %39 {strides = array<i32>} : memref<8x64xf32, #tpu.memory_space<vmem>>, vector<8x32xf32>,
    %41 = vector.extract_strided_slice %37 {offsets = [0, 32], sizes = [8, 32], strides = [1, 1]} : vector<8x64xf32> to vector<8x32xf32>
    %42 = arith.mulf %21, %41 : vector<8x32xf32>
    %c0_24 = arith.constant 0 : index
    %c32 = arith.constant 32 : index
    %43 = vector.load %arg9[%c0_24, %c32] : memref<8x64xf32, #tpu.memory_space<vmem>>, vector<8x32xf32>
    tpu.vector_store %arg9[%c0_24, %c32], %42 {strides = array<i32>} : memref<8x64xf32, #tpu.memory_space<vmem>>, vector<8x32xf32>,
    return
  }
  func.func @transform_0(%arg0: i32) -> (i32, i32) {
    %c0_i32 = arith.constant 0 : i32
    %c0_i32_0 = arith.constant 0 : i32
    return %arg0, %c0_i32 : i32, i32
  }
  func.func @transform_1(%arg0: i32) -> (i32, i32) {
    %c0_i32 = arith.constant 0 : i32
    %c0_i32_0 = arith.constant 0 : i32
    return %arg0, %c0_i32 : i32, i32
  }
  func.func @transform_2(%arg0: i32) -> (i32, i32) {
    %c0_i32 = arith.constant 0 : i32
    %c0_i32_0 = arith.constant 0 : i32
    %c0_i32_1 = arith.constant 0 : i32
    return %c0_i32, %c0_i32_0 : i32, i32
  }
  func.func @transform_3(%arg0: i32) -> (i32, i32) {
    %c0_i32 = arith.constant 0 : i32
    %c0_i32_0 = arith.constant 0 : i32
    %c0_i32_1 = arith.constant 0 : i32
    return %c0_i32, %c0_i32_0 : i32, i32
  }
  func.func @transform_4(%arg0: i32) -> (i32, i32) {
    %c0_i32 = arith.constant 0 : i32
    %c0_i32_0 = arith.constant 0 : i32
    %c0_i32_1 = arith.constant 0 : i32
    return %c0_i32, %c0_i32_0 : i32, i32
  }
  func.func @transform_5(%arg0: i32) -> (i32, i32) {
    %c0_i32 = arith.constant 0 : i32
    %c0_i32_0 = arith.constant 0 : i32
    %c0_i32_1 = arith.constant 0 : i32
    return %c0_i32, %c0_i32_0 : i32, i32
  }
  func.func @transform_6(%arg0: i32) -> (i32, i32) {
    %c0_i32 = arith.constant 0 : i32
    %c0_i32_0 = arith.constant 0 : i32
    %c0_i32_1 = arith.constant 0 : i32
    return %c0_i32, %c0_i32_0 : i32, i32
  }
  func.func @transform_7(%arg0: i32) -> (i32, i32) {
    %c0_i32 = arith.constant 0 : i32
    %c0_i32_0 = arith.constant 0 : i32
    %c0_i32_1 = arith.constant 0 : i32
    return %c0_i32, %c0_i32_0 : i32, i32
  }
  func.func @transform_8(%arg0: i32) -> (i32, i32) {
    %c0_i32 = arith.constant 0 : i32
    %c0_i32_0 = arith.constant 0 : i32
    return %arg0, %c0_i32 : i32, i32
  }
}

module attributes {stable_mosaic.version = 11 : i64} {
  func.func @_gate_kernel(%arg0: i32, %arg1: memref<8x32xf32, #tpu.memory_space<vmem>>, %arg2: memref<8x32xf32, #tpu.memory_space<vmem>>, %arg3: memref<32x64xbf16, #tpu.memory_space<vmem>>, %arg4: memref<32x64xbf16, #tpu.memory_space<vmem>>, %arg5: memref<1x64xf32, #tpu.memory_space<vmem>>, %arg6: memref<32x64xbf16, #tpu.memory_space<vmem>>, %arg7: memref<32x64xbf16, #tpu.memory_space<vmem>>, %arg8: memref<1x64xf32, #tpu.memory_space<vmem>>, %arg9: memref<8x64xf32, #tpu.memory_space<vmem>>) attributes {dimension_semantics = [#tpu.dimension_semantics<parallel>], iteration_bounds = array<i64: 2>, scalar_prefetch = 0 : i64, scratch_operands = 0 : i64, tpu.core_type = #tpu.core_type<tc>, window_params = [{transform_indices = @transform_0, window_bounds = array<i64: 8, 32>}, {transform_indices = @transform_1, window_bounds = array<i64: 8, 32>}, {pipeline_mode = #tpu.pipeline_mode<synchronous>, transform_indices = @transform_2, window_bounds = array<i64: 32, 64>}, {pipeline_mode = #tpu.pipeline_mode<synchronous>, transform_indices = @transform_3, window_bounds = array<i64: 32, 64>}, {pipeline_mode = #tpu.pipeline_mode<synchronous>, transform_indices = @transform_4, window_bounds = array<i64: 1, 64>}, {pipeline_mode = #tpu.pipeline_mode<synchronous>, transform_indices = @transform_5, window_bounds = array<i64: 32, 64>}, {pipeline_mode = #tpu.pipeline_mode<synchronous>, transform_indices = @transform_6, window_bounds = array<i64: 32, 64>}, {pipeline_mode = #tpu.pipeline_mode<synchronous>, transform_indices = @transform_7, window_bounds = array<i64: 1, 64>}, {transform_indices = @transform_8, window_bounds = array<i64: 8, 64>}]} {
    %c0 = arith.constant 0 : index
    %c0_0 = arith.constant 0 : index
    %0 = vector.load %arg1[%c0, %c0_0] : memref<8x32xf32, #tpu.memory_space<vmem>>, vector<8x32xf32>
    %c0_1 = arith.constant 0 : index
    %c0_2 = arith.constant 0 : index
    %1 = vector.load %arg2[%c0_1, %c0_2] : memref<8x32xf32, #tpu.memory_space<vmem>>, vector<8x32xf32>
    %2 = arith.truncf %0 : vector<8x32xf32> to vector<8x32xbf16>
    %c0_3 = arith.constant 0 : index
    %c0_4 = arith.constant 0 : index
    %3 = vector.load %arg3[%c0_3, %c0_4] : memref<32x64xbf16, #tpu.memory_space<vmem>>, vector<32x64xbf16>
    %cst = arith.constant dense<0.000000e+00> : vector<8x64xf32>
    %4 = tpu.matmul %2, %3, %cst {dimension_numbers = #tpu.dot_dimension_numbers<[1], [0], [0], [1], [0, 0, 1, 1], [], []>} : vector<8x32xbf16>, vector<32x64xbf16>, vector<8x64xf32> -> vector<8x64xf32>
    %5 = arith.truncf %1 : vector<8x32xf32> to vector<8x32xbf16>
    %c0_5 = arith.constant 0 : index
    %c0_6 = arith.constant 0 : index
    %6 = vector.load %arg4[%c0_5, %c0_6] : memref<32x64xbf16, #tpu.memory_space<vmem>>, vector<32x64xbf16>
    %cst_7 = arith.constant dense<0.000000e+00> : vector<8x64xf32>
    %7 = tpu.matmul %5, %6, %cst_7 {dimension_numbers = #tpu.dot_dimension_numbers<[1], [0], [0], [1], [0, 0, 1, 1], [], []>} : vector<8x32xbf16>, vector<32x64xbf16>, vector<8x64xf32> -> vector<8x64xf32>
    %8 = arith.addf %4, %7 : vector<8x64xf32>
    %c0_8 = arith.constant 0 : index
    %c0_9 = arith.constant 0 : index
    %9 = vector.load %arg5[%c0_8, %c0_9] : memref<1x64xf32, #tpu.memory_space<vmem>>, vector<1x64xf32>
    %10 = vector.broadcast %9 : vector<1x64xf32> to vector<8x64xf32>
    %11 = arith.addf %8, %10 : vector<8x64xf32>
    %cst_10 = arith.constant 0.000000e+00 : f32
    %12 = vector.broadcast %cst_10 : f32 to vector<8x64xf32>
    %13 = arith.subf %12, %11 : vector<8x64xf32>
    %14 = math.exp %13 : vector<8x64xf32>
    %cst_11 = arith.constant 1.000000e+00 : f32
    %15 = vector.broadcast %cst_11 : f32 to vector<8x64xf32>
    %16 = arith.addf %15, %14 : vector<8x64xf32>
    %17 = tpu.reciprocal %16 {approx = true} : vector<8x64xf32> -> vector<8x64xf32>
    %18 = vector.extract_strided_slice %17 {offsets = [0, 0], sizes = [8, 32], strides = [1, 1]} : vector<8x64xf32> to vector<8x32xf32>
    %19 = arith.mulf %0, %18 : vector<8x32xf32>
    %20 = vector.extract_strided_slice %17 {offsets = [0, 32], sizes = [8, 32], strides = [1, 1]} : vector<8x64xf32> to vector<8x32xf32>
    %21 = arith.mulf %1, %20 : vector<8x32xf32>
    %22 = arith.truncf %19 : vector<8x32xf32> to vector<8x32xbf16>
    %c0_12 = arith.constant 0 : index
    %c0_13 = arith.constant 0 : index
    %23 = vector.load %arg6[%c0_12, %c0_13] : memref<32x64xbf16, #tpu.memory_space<vmem>>, vector<32x64xbf16>
    %cst_14 = arith.constant dense<0.000000e+00> : vector<8x64xf32>
    %24 = tpu.matmul %22, %23, %cst_14 {dimension_numbers = #tpu.dot_dimension_numbers<[1], [0], [0], [1], [0, 0, 1, 1], [], []>} : vector<8x32xbf16>, vector<32x64xbf16>, vector<8x64xf32> -> vector<8x64xf32>
    %25 = arith.truncf %21 : vector<8x32xf32> to vector<8x32xbf16>
    %c0_15 = arith.constant 0 : index
    %c0_16 = arith.constant 0 : index
    %26 = vector.load %arg7[%c0_15, %c0_16] : memref<32x64xbf16, #tpu.memory_space<vmem>>, vector<32x64xbf16>
    %cst_17 = arith.constant dense<0.000000e+00> : vector<8x64xf32>
    %27 = tpu.matmul %25, %26, %cst_17 {dimension_numbers = #tpu.dot_dimension_numbers<[1], [0], [0], [1], [0, 0, 1, 1], [], []>} : vector<8x32xbf16>, vector<32x64xbf16>, vector<8x64xf32> -> vector<8x64xf32>
    %28 = arith.addf %24, %27 : vector<8x64xf32>
    %c0_18 = arith.constant 0 : index
    %c0_19 = arith.constant 0 : index
    %29 = vector.load %arg8[%c0_18, %c0_19] : memref<1x64xf32, #tpu.memory_space<vmem>>, vector<1x64xf32>
    %30 = vector.broadcast %29 : vector<1x64xf32> to vector<8x64xf32>
    %31 = arith.addf %28, %30 : vector<8x64xf32>
    %cst_20 = arith.constant 0.000000e+00 : f32
    %32 = vector.broadcast %cst_20 : f32 to vector<8x64xf32>
    %33 = arith.subf %32, %31 : vector<8x64xf32>
    %34 = math.exp %33 : vector<8x64xf32>
    %cst_21 = arith.constant 1.000000e+00 : f32
    %35 = vector.broadcast %cst_21 : f32 to vector<8x64xf32>
    %36 = arith.addf %35, %34 : vector<8x64xf32>
    %37 = tpu.reciprocal %36 {approx = true} : vector<8x64xf32> -> vector<8x64xf32>
    %38 = vector.extract_strided_slice %37 {offsets = [0, 0], sizes = [8, 32], strides = [1, 1]} : vector<8x64xf32> to vector<8x32xf32>
    %39 = arith.mulf %19, %38 : vector<8x32xf32>
    %c0_22 = arith.constant 0 : index
    %c0_23 = arith.constant 0 : index
    %40 = vector.load %arg9[%c0_22, %c0_23] : memref<8x64xf32, #tpu.memory_space<vmem>>, vector<8x32xf32>
    tpu.vector_store %arg9[%c0_22, %c0_23], %39 {strides = array<i32>} : memref<8x64xf32, #tpu.memory_space<vmem>>, vector<8x32xf32>,
    %41 = vector.extract_strided_slice %37 {offsets = [0, 32], sizes = [8, 32], strides = [1, 1]} : vector<8x64xf32> to vector<8x32xf32>
    %42 = arith.mulf %21, %41 : vector<8x32xf32>
    %c0_24 = arith.constant 0 : index
    %c32 = arith.constant 32 : index
    %43 = vector.load %arg9[%c0_24, %c32] : memref<8x64xf32, #tpu.memory_space<vmem>>, vector<8x32xf32>
    tpu.vector_store %arg9[%c0_24, %c32], %42 {strides = array<i32>} : memref<8x64xf32, #tpu.memory_space<vmem>>, vector<8x32xf32>,
    return
  }
  func.func @transform_0(%arg0: i32) -> (i32, i32) {
    %c0_i32 = arith.constant 0 : i32
    %c0_i32_0 = arith.constant 0 : i32
    return %arg0, %c0_i32 : i32, i32
  }
  func.func @transform_1(%arg0: i32) -> (i32, i32) {
    %c0_i32 = arith.constant 0 : i32
    %c0_i32_0 = arith.constant 0 : i32
    return %arg0, %c0_i32 : i32, i32
  }
  func.func @transform_2(%arg0: i32) -> (i32, i32) {
    %c0_i32 = arith.constant 0 : i32
    %c0_i32_0 = arith.constant 0 : i32
    %c0_i32_1 = arith.constant 0 : i32
    return %c0_i32, %c0_i32_0 : i32, i32
  }
  func.func @transform_3(%arg0: i32) -> (i32, i32) {
    %c0_i32 = arith.constant 0 : i32
    %c0_i32_0 = arith.constant 0 : i32
    %c0_i32_1 = arith.constant 0 : i32
    return %c0_i32, %c0_i32_0 : i32, i32
  }
  func.func @transform_4(%arg0: i32) -> (i32, i32) {
    %c0_i32 = arith.constant 0 : i32
    %c0_i32_0 = arith.constant 0 : i32
    %c0_i32_1 = arith.constant 0 : i32
    return %c0_i32, %c0_i32_0 : i32, i32
  }
  func.func @transform_5(%arg0: i32) -> (i32, i32) {
    %c0_i32 = arith.constant 0 : i32
    %c0_i32_0 = arith.constant 0 : i32
    %c0_i32_1 = arith.constant 0 : i32
    return %c0_i32, %c0_i32_0 : i32, i32
  }
  func.func @transform_6(%arg0: i32) -> (i32, i32) {
    %c0_i32 = arith.constant 0 : i32
    %c0_i32_0 = arith.constant 0 : i32
    %c0_i32_1 = arith.constant 0 : i32
    return %c0_i32, %c0_i32_0 : i32, i32
  }
  func.func @transform_7(%arg0: i32) -> (i32, i32) {
    %c0_i32 = arith.constant 0 : i32
    %c0_i32_0 = arith.constant 0 : i32
    %c0_i32_1 = arith.constant 0 : i32
    return %c0_i32, %c0_i32_0 : i32, i32
  }
  func.func @transform_8(%arg0: i32) -> (i32, i32) {
    %c0_i32 = arith.constant 0 : i32
    %c0_i32_0 = arith.constant 0 : i32
    return %arg0, %c0_i32 : i32, i32
  }
}

</mosaic_0001>

<bundles_post_ra>
// kernel: tpu_custom_call.1
= control target key start
LH: loop header
LB: loop body
LE: loop exit
PB: predicated region body
PF: predicated region fallthrough
CT: control target
= control target key end

     0   :  { %s1454_s0 = inlined_call_operand.hbm [shape: f32[16,32], index: 0, kind: input, shape index: {}]   ;;  %s1455_s1 = inlined_call_operand.hbm [shape: f32[16,32], index: 1, kind: input, shape index: {}]   ;;  %s1456_s2 = inlined_call_operand.hbm [shape: bf16[32,64], index: 2, kind: input, shape index: {}]   ;;  %s1457_s3 = inlined_call_operand.hbm [shape: bf16[32,64], index: 3, kind: input, shape index: {}]   ;;  %s1458_s4 = inlined_call_operand.vmem [shape: f32[1,64], index: 4, kind: input, shape index: {}]   ;;  %s1459_s5 = inlined_call_operand.hbm [shape: bf16[32,64], index: 5, kind: input, shape index: {}]   ;;  %s1460_s6 = inlined_call_operand.hbm [shape: bf16[32,64], index: 6, kind: input, shape index: {}]   ;;  %s1461_s7 = inlined_call_operand.vmem [shape: f32[1,64], index: 7, kind: input, shape index: {}]   ;;  %s1462_s8 = inlined_call_operand.hbm [shape: f32[16,64], index: 8, kind: output, shape index: {}]  }
   0x1   :  { %1466 = sst [smem:[#allocation23_spill]] %s1456_s2 }
   0x2   :  { %1467 = sst [smem:[#allocation24_spill]] %s1457_s3 }
   0x3   :  { %1468 = sst [smem:[#allocation25_spill]] %s1459_s5 }
   0x4   :  { %1469 = sst [smem:[#allocation26_spill]] %s1460_s6 }
   0x5   :  { %13 = vsyncpa [#allocation3], 0 }
   0x6   :  { %15 = vsyncpa [#allocation3 + $0x1], 0 }
   0x7   :  { %16 = vsyncpa [#allocation6], 0 }
   0x8   :  { %18 = vsyncpa [#allocation6 + $0x1], 0 }
   0x9   :  { %19 = vsyncpa [#allocation9], 0 }
   0xa   :  { %20 = vsyncpa [#allocation12], 0 }
   0xb   :  { %21 = vsyncpa [#allocation4], 0 }
   0xc   :  { %23 = vsyncpa [#allocation4 + $0x1], 0  ;;  %s1240_s27 = smov 0   ;;  %s1242_s28 = smov 0  }
   0xd   :  { %s1244_s29 = smov 0   ;;  %s1246_s30 = smov 0  }
   0xe LB: > { %1470 = sst [smem:[#allocation20_spill]] %s1181_s29  ;;  %s1264_s12 = sadd.s32 4294967295, %s1185_s30   ;;  %s1185_s30 = sphi %s1246_s30, %s1485_s30   ;;  %s1181_s29 = sphi %s1244_s29, %s1487_s29   ;;  %s1177_s28 = sphi %s1242_s28, %s1489_s28   ;;  %s1173_s27 = sphi %s1240_s27, %s1488_s27  }
   0xf   : > { %s1471_s2 = sld [smem:[#allocation23_spill]]  ;;  %p751_p0 = scmp.ge.s32.totalorder %s1185_s30, 1 }
  0x10   : > { %p50_p1 = scmp.eq.s32.totalorder %s1264_s12, 0  ;;  %p238_p2 = scmp.lt.s32.totalorder %s1185_s30, 3 }
  0x11   : > { %s1187_s14 = smov [#allocation7]   ;;  %s1473_s3 = sld [smem:[#allocation24_spill]] }
  0x12   : > { %p1269_p3 = pnand %p751_p0, %p238_p2  ;;  %s251_s15 = sshll.u32 %s1187_s14, 4  ;;  %s252_s15 = int_to_ptr.vmem [resolvable:$true] %s251_s15 }
  0x13   : > { %s1475_s5 = sld [smem:[#allocation25_spill]]  ;;  %s1188_s23 = smov [#allocation8]  }
  0x14   : > { %p839_p4 = pneg %p1269_p3  ;;  %s265_s24 = sshll.u32 %s1188_s23, 4  ;;  %s266_s24 = int_to_ptr.vmem [resolvable:$true] %s265_s24 }
  0x15   : > { %s249_s11 = sshll.u32 %s1471_s2, 4  ;;  %s1189_s25 = smov 64   ;;  %s250_s11 = int_to_ptr.hbm [resolvable:$true] %s249_s11 }
  0x16   : > { %p1281_p6 = pnand %p839_p4, %p50_p1  ;;  %s1190_s26 = smov 4  }
  0x17   : > { %s263_s18 = sshll.u32 %s1473_s3, 4  ;;  %s1476_s6 = sld [smem:[#allocation26_spill]]  ;;  %s264_s18 = int_to_ptr.hbm [resolvable:$true] %s263_s18 }
  0x18   : > { %842 = dma.hbm_to_vmem [thread:$0]  (!%p1281_p6), %s250_s11, 256, %s252_s15, [#allocation6], %s1189_s25, %s1189_s25, %s1190_s26  }
  0x19   : > { %s280_s22 = sshll.u32 %s1475_s5, 4  ;;  %s1191_s16 = smov [#allocation10]   ;;  %s281_s22 = int_to_ptr.hbm [resolvable:$true] %s280_s22 }
  0x1a   : > { %845 = dma.hbm_to_vmem [thread:$0]  (!%p1281_p6), %s264_s18, 256, %s266_s24, [#allocation9], %s1189_s25, %s1189_s25, %s1190_s26  }
  0x1b   : > { %s282_s17 = sshll.u32 %s1191_s16, 4  ;;  %s1192_s11 = smov [#allocation11]   ;;  %s283_s17 = int_to_ptr.vmem [resolvable:$true] %s282_s17 }
  0x1c   : > { %848 = dma.hbm_to_vmem [thread:$0]  (!%p1281_p6), %s281_s22, 256, %s283_s17, [#allocation9], %s1189_s25, %s1189_s25, %s1190_s26  }
  0x1d   : > { %s294_s14 = sshll.u32 %s1476_s6, 4  ;;  %s296_s15 = sshll.u32 %s1192_s11, 4  ;;  %s295_s14 = int_to_ptr.hbm [resolvable:$true] %s294_s14  ;;  %s297_s15 = int_to_ptr.vmem [resolvable:$true] %s296_s15 }
  0x1e   : > { %851 = dma.hbm_to_vmem [thread:$0]  (!%p1281_p6), %s295_s14, 256, %s297_s15, [#allocation12], %s1189_s25, %s1189_s25, %s1190_s26  }
  0x1f   : > { %s750_s18 = sadd.s32 4294967294, %s1185_s30   ;;  %s1301_s20 = sadd.s32 1, %s1185_s30  }
  0x20   : > { %1477 = sst [smem:[#allocation21_spill]] %s1301_s20  ;;  %s33_s21 = ssub.s32 %s1185_s30, %s1301_s20 }
  0x21   : > { %s36_s23 = sadd.s32 1, %s1181_s29  ;;  %p34_p7 = scmp.eq.s32.totalorder %s33_s21, 0 }
  0x22   : > { %p43_p8 = scmp.ne.s32.totalorder %s1181_s29, %s1177_s28  ;;  %p44_p9 = scmp.eq.s32.totalorder %s1185_s30, 0 }
  0x23   : > { %p49_p10 = scmp.ne.s32.totalorder %s1177_s28, %s1173_s27  ;;  %p225_p13 = scmp.eq.s32.totalorder %s1264_s12, 1 }
  0x24   : > { %s1312_s22 = scalar_select %p34_p7, %s1181_s29, %s36_s23  }
  0x25   : > { %p1314_p11 = por %p44_p9, %p43_p8  ;;  %p1320_p12 = por %p50_p1, %p49_p10 }
  0x26   : > { %1478 = sst [smem:[#allocation22_spill]] %s1312_s22  ;;  %p231_p0 = scmp.eq.s32.totalorder %s750_s18, 1 }
  0x27   : > { %p867_p2 = scmp.lt.s32.totalorder %s1185_s30, 2  ;;  %s313_s25 = sand.u32 1, %s1181_s29  }
  0x28   : > { %p1327_p4 = por %p225_p13, %p43_p8  ;;  %p1331_p6 = por %p231_p0, %p49_p10 }
  0x29   : > { %s1335_s10 = sshll.u32 %s313_s25, 3  ;;  %s758_s14 = sshll.u32 %s1185_s30, 3 }
  0x2a   : > { %s321_s11 = scalar_lea.hbm %s1454_s0, %s758_s14  ;;  %s317_s15 = scalar_lea.vmem [#allocation2], %s1335_s10 }
  0x2b   : > { %s325_s18 = sshll.u32 %s317_s15, 4  ;;  %s323_s21 = sshll.u32 %s321_s11, 4  ;;  %s326_s18 = int_to_ptr.vmem [resolvable:$true] %s325_s18  ;;  %s324_s21 = int_to_ptr.hbm [resolvable:$true] %s323_s21 }
  0x2c   : > { %p1344_p7 = pnand %p867_p2, %p1314_p11  ;;  %s340_s5 = scalar_lea.hbm %s1455_s1, %s758_s14 }
  0x2d   : > { %s332_s6 = sand.u32 1, %s1185_s30   ;;  %s314_s22 = scalar_lea.sflag [#allocation3], %s313_s25 }
  0x2e   : > { %s1043_s16 = sshra.s32 %s324_s21, 4  ;;  %p1047_p9 = pneg %p1344_p7  ;;  %s1044_s16 = int_to_ptr.hbm [resolvable:$true] %s1043_s16 }
  0x2f   : > { %s1045_s17 = scalar_lea.hbm %s1044_s16, 8  ;;  %s1050_s15 = scalar_lea.hbm %s1454_s0, 16 }
  0x30   : > { %p1046_p8 = scmp.ne.s32.totalorder %s1044_s16, %s1045_s17  ;;  %p1051_p13 = scmp.lt.s32.totalorder %s1044_s16, %s1454_s0 }
  0x31   : > { %p1052_p0 = scmp.lt.s32.totalorder %s1050_s15, %s1045_s17 }
  0x32   : > { %p1048_p10 = pnand %p1047_p9, %p1046_p8 }
  0x33   : > { %p1053_p2 = por %p1052_p0, %p1051_p13 }
  0x34   : > { %p1049_p11 = pneg %p1048_p10 }
  0x36   : > { %p1054_p5 = pnand %p1053_p2, %p1049_p11 }
  0x38   : > { %1057 = shalt.err (!%p1054_p5)
}
  0x39   : > { %855 = dma.hbm_to_vmem [thread:$0]  (!%p1344_p7), %s324_s21, 128, %s326_s18, %s314_s22  }
  0x3a   : > { %s342_s25 = sshll.u32 %s340_s5, 4  ;;  %s336_s14 = scalar_lea.vmem [#allocation5], %s1335_s10  ;;  %s343_s25 = int_to_ptr.hbm [resolvable:$true] %s342_s25 }
  0x3b   : > { %s344_s29 = sshll.u32 %s336_s14, 4  ;;  %s333_s24 = scalar_lea.sflag [#allocation6], %s332_s6  ;;  %s345_s29 = int_to_ptr.vmem [resolvable:$true] %s344_s29 }
  0x3c   : > { %s1073_s11 = sshra.s32 %s343_s25, 4  ;;  %s1080_s15 = scalar_lea.hbm %s1455_s1, 16  ;;  %s1074_s11 = int_to_ptr.hbm [resolvable:$true] %s1073_s11 }
  0x3d   : > { %s1075_s20 = scalar_lea.hbm %s1074_s11, 8  ;;  %p1081_p5 = scmp.lt.s32.totalorder %s1074_s11, %s1455_s1 }
  0x3e   : > { %p1076_p8 = scmp.ne.s32.totalorder %s1074_s11, %s1075_s20  ;;  %p1082_p13 = scmp.lt.s32.totalorder %s1080_s15, %s1075_s20 }
  0x40   : > { %p1078_p10 = pnand %p1076_p8, %p1047_p9  ;;  %p1083_p0 = por %p1082_p13, %p1081_p5 }
  0x42   : > { %p1079_p11 = pneg %p1078_p10 }
  0x44   : > { %p1084_p2 = pnand %p1083_p0, %p1079_p11 }
  0x46   : > { %1087 = shalt.err (!%p1084_p2)
}
  0x47   : > { %858 = dma.hbm_to_vmem [thread:$0]  (!%p1344_p7), %s343_s25, 128, %s345_s29, %s333_s24  }
  0x48   : > { %353 = sbr.rel (%p1269_p3) target bundleno = 755 (0x2f3), region = 52  ;;  %s1380_s5 = sand.u32 (!%p1269_p3), 1, %s1177_s28  }
  0x49   : > { %s1383_s6 = sshll.u32 (!%p1269_p3), %s1380_s5, 3  ;;  %s356_s10 = scalar_lea.sflag (!%p1269_p3), [#allocation3], %s1380_s5 }
  0x4a   : > { %s359_s20 = scalar_lea.vmem (!%p1269_p3), [#allocation2], %s1383_s6 }
  0x4d   : > { %1148 = dma.done.wait (%p1320_p12), %s356_s10, 128  }
  0x4e   : > { %1150 = vsyncadd (%p1320_p12), %s356_s10, 4294967168  ;;  %s365_s29 = sand.u32 1, %s1264_s12   ;;  %s369_s18 = scalar_lea.vmem [#allocation5], %s1383_s6 }
  0x4f   : > { %s366_s13 = scalar_lea.sflag [#allocation6], %s365_s29 }
  0x50   : > { %1152 = dma.done.wait (%p1320_p12), %s366_s13, 128  }
  0x51   : > { %1154 = vsyncadd (%p1320_p12), %s366_s13, 4294967168 }
  0x52   : > { %1156 = dma.done.wait (%p50_p1), [#allocation6], 256  }
  0x53   : > { %1158 = vsyncadd (%p50_p1), [#allocation6], 4294967040 }
  0x54   : > { %1160 = dma.done.wait (%p50_p1), [#allocation9], 512  }
  0x55   : > { %1162 = vsyncadd (%p50_p1), [#allocation9], 4294966784 }
  0x56   : > { %1164 = dma.done.wait (%p50_p1), [#allocation12], 256  }
  0x57   : > { %1166 = vsyncadd (%p50_p1), [#allocation12], 4294967040  ;;  %v812_v0 = vld [vmem:[#allocation8 + $0x8] sm:$0xff]  ;;  %v810_v1 = vld [vmem:[#allocation7 + $0x8] sm:$0xff]  ;;  %vm453_vm0 = vcmask 261120   ;;  %s1193_s23 = smov 96  }
  0x58   : > { %v811_v2 = vld [vmem:[#allocation8] sm:$0xff]  ;;  %v809_v3 = vld [vmem:[#allocation7] sm:$0xff]  ;;  %463 = vmatpush.bf16.msra.mxu0 %v812_v0  ;;  %491 = vmatpush.bf16.msra.mxu1 %v810_v1  ;;  %v814_v8 = vld [vmem:[#allocation10 + $0x8] sm:$0xff]  ;;  %s427_s14 = scalar_lea.vmem [#allocation13], %s1383_s6  ;;  %s1194_s24 = smov 32   ;;  %vm601_vm1 = vcmask 523520  }
  0x59   : > { %v430_v4 = vld [vmem:[%s369_s18] sm:$0xff]  ;;  %v429_v5 = vld [vmem:[%s359_s20] sm:$0xff]  ;;  %573 = vmatpush.bf16.msra.mxu3 %v814_v8  ;;  %s806_s11 = sshll.u32 %s1264_s12, 3  ;;  %s616_s2 = sshll.u32 %s427_s14, 4  ;;  %s617_s2 = int_to_ptr.vmem [resolvable:$true] %s616_s2 }
  0x5a   : > { %v436_v6 = vpack.c.bf16 %v430_v4, %v430_v4  ;;  %v431_v7 = vpack.c.bf16 %v429_v5, %v429_v5  ;;  %v813_v9 = vld [vmem:[#allocation10] sm:$0xff]  ;;  %v816_v10 = vld [vmem:[#allocation11 + $0x8] sm:$0xff]  ;;  %v815_v25 = vld [vmem:[#allocation11] sm:$0xff]  ;;  %s614_s15 = scalar_lea.hbm %s1462_s8, %s806_s11  ;;  %s604_s6 = scalar_lea.sflag [#allocation4], %s1380_s5 }
  0x5b   : > { %v913_v11 = vld [vmem:[%s1458_s4] ss:$0 sm:$0xff]  ;;  %545 = vmatpush.bf16.msra.mxu2 %v816_v10  ;;  %s618_s22 = sshll.u32 %s614_s15, 4  ;;  %s1123_s13 = scalar_lea.hbm %s1462_s8, 16  ;;  %s619_s22 = int_to_ptr.hbm [resolvable:$true] %s618_s22 }
  0x5c   : > { %464 = vmatpush.bf16.msra.mxu0 %v811_v2  ;;  %492 = vmatpush.bf16.msra.mxu1 %v809_v3  ;;  %v914_v31 = vld [vmem:[%s1461_s7] ss:$0 sm:$0xff]  ;;  %s1117_s10 = sshra.s32 %s619_s22, 4  ;;  %s1118_s10 = int_to_ptr.hbm [resolvable:$true] %s1117_s10 }
  0x5d   : > { %574 = vmatpush.bf16.msra.mxu3 %v813_v9  ;;  %s1119_s20 = scalar_lea.hbm %s1118_s10, 8  ;;  %p1124_p7 = scmp.lt.s32.totalorder %s1118_s10, %s1462_s8 }
  0x5e   : > { %p1120_p1 = scmp.ne.s32.totalorder %s1118_s10, %s1119_s20  ;;  %p1125_p9 = scmp.lt.s32.totalorder %s1123_s13, %s1119_s20 }
  0x5f   : > { %777 = vmatmul.msk.bf16.vlgmr.msra.gmra.mxu0 %vm453_vm0, %v436_v6  ;;  %786 = vmatmul.msk.bf16.vlgmr.msra.gmra.mxu1 %vm453_vm0, %v431_v7 }
  0x60   : > { %546 = vmatpush.bf16.msra.mxu2 %v815_v25  ;;  %p1121_p3 = pnand %p1120_p1, %p1327_p4  ;;  %p1126_p8 = por %p1125_p9, %p1124_p7 }
  0x62   : > { %p1122_p12 = pneg %p1121_p3 }
  0x64   : > { %p1127_p10 = pnand %p1126_p8, %p1122_p12 }
  0xdc   : > { %v466_v12 = vpop.f32.mrf.mxu0  ;;  %v494_v13 = vpop.f32.mrf.mxu1 }
  0xdd   : > { %v495_v14 = vadd.f32 %v494_v13, %v466_v12 }
  0xdf   : > { %v502_v15 = vadd.f32 %v913_v11, %v495_v14 }
  0xe1   : > { %v503_v16 = vsub.f32 0.0, %v502_v15 }
  0xe3   : > { %v504_v17 = vmul.f32 1.442695, %v503_v16 }
  0xe4   : > { %v468_v18 = vpop.f32.mrf.mxu0  ;;  %v496_v19 = vpop.f32.mrf.mxu1 }
  0xe5   : > { %915 = vpow2.f32 %v504_v17 }
  0xeb   : > { %v916_v20 = vpop.eup %915 }
  0xec   : > { %v506_v21 = vadd.f32 1.0, %v916_v20 }
  0xee   : > { %917 = vrcp.f32 %v506_v21 }
  0xf4   : > { %v918_v22 = vpop.eup %917 }
  0xf5   : > { %510 = vrot.lane.b32.xlu0 %v918_v22, %s1193_s23  ;;  %v508_v23 = vmul.f32 %v918_v22, %v429_v5 }
  0xf7   : > { %v514_v24 = vpack.c.bf16 %v508_v23, %v508_v23 }
  0xf9   : > { %804 = vmatmul.msk.bf16.vlgmr.msra.gmra.mxu3 %vm453_vm0, %v514_v24 }
 0x167   : > { %v511_v26 = vpop.permute.xlu0 %510 }
 0x168   : > { %v513_v27 = vmul.f32 %v511_v26, %v430_v4 }
 0x16a   : > { %v519_v28 = vpack.c.bf16 %v513_v27, %v513_v27 }
 0x16c   : > { %795 = vmatmul.msk.bf16.vlgmr.msra.gmra.mxu2 %vm453_vm0, %v519_v28 }
 0x17c   : > { %v576_v29 = vpop.f32.mrf.mxu3 }
 0x184   : > { %v578_v30 = vpop.f32.mrf.mxu3 }
 0x1ef   : > { %v548_v32 = vpop.f32.mrf.mxu2 }
 0x1f0   : > { %v577_v33 = vadd.f32 %v576_v29, %v548_v32 }
 0x1f2   : > { %v584_v34 = vadd.f32 %v914_v31, %v577_v33 }
 0x1f4   : > { %v585_v35 = vsub.f32 0.0, %v584_v34 }
 0x1f6   : > { %v586_v36 = vmul.f32 1.442695, %v585_v35 }
 0x1f7   : > { %v550_v37 = vpop.f32.mrf.mxu2 }
 0x1f8   : > { %919 = vpow2.f32 %v586_v36 }
 0x1fe   : > { %v920_v38 = vpop.eup %919 }
 0x1ff   : > { %v588_v39 = vadd.f32 1.0, %v920_v38 }
 0x201   : > { %921 = vrcp.f32 %v588_v39 }
 0x207   : > { %v922_v40 = vpop.eup %921 }
 0x208   : > { %v590_v41 = vmul.f32 %v922_v40, %v508_v23  ;;  %593 = vrot.lane.b32.xlu0 %v922_v40, %s1193_s23 }
 0x20a   : > { %591 = vst.msk [vmem:[%s427_s14] sm:$0xff] %vm453_vm0, %v590_v41 }
 0x27a   : > { %v594_v42 = vpop.permute.xlu0 %593 }
 0x27b   : > { %v596_v43 = vmul.f32 %v594_v42, %v513_v27 }
 0x27d   : > { %598 = vrot.lane.b32.xlu1 %v596_v43, %s1194_s24 }
 0x2ef   : > { %v599_v44 = vpop.permute.xlu1 %598 }
 0x2f0   : > { %602 = vst.msk [vmem:[%s427_s14] sm:$0xff] %vm601_vm1, %v599_v44 }
 0x2f1   : > { %1130 = shalt.err (!%p1127_p10)
}
 0x2f2   : > { %837 = dma.vmem_to_hbm [thread:$0]  (%p1327_p4), %s617_s2, 128, %s619_s22, %s604_s6  }
 0x2f3 PF: > { %s630_s5 = sand.u32 1, %s1173_s27   ;;  %p1484_p11 = scmp.ge.s32.totalorder %s1185_s30, 2 }
 0x2f4   : > { %s631_s21 = scalar_lea.sflag [#allocation4], %s630_s5 }
 0x2f5   : > { %p860_p5 = pnand %p1484_p11, %p1331_p6 }
 0x2f7   : > { %p861_p13 = pneg %p860_p5 }
 0x2f9   : > { %1168 = dma.done.wait (%p861_p13), %s631_s21, 128  }
 0x2fa   : > { %1170 = vsyncadd (%p861_p13), %s631_s21, 4294967168  ;;  %s1485_s30 = sld [smem:[#allocation21_spill]]  ;;  %s1488_s27 = smov %s1177_s28 }
 0x2fb   : > { %s1486_s23 = sld [smem:[#allocation20_spill]] }
 0x2fc   : > { %s1487_s29 = sld [smem:[#allocation22_spill]] }
 0x300   : > { %p26_p0 = scmp.ge.s32.totalorder %s1485_s30, 4  }
 0x301   : > { %s1489_s28 = smov %s1486_s23 }
 0x302   :  { %28 = sbr.rel (!%p26_p0) target bundleno = 14 (0xe), region = 126 }
 0x307   :  { %637 = vsyncpa [#allocation3], 1 }
 0x308   :  { %639 = vsyncpa [#allocation3 + $0x1], 1 }
 0x309   :  { %640 = vsyncpa [#allocation6], 1 }
 0x30a   :  { %642 = vsyncpa [#allocation6 + $0x1], 1 }
 0x30b   :  { %643 = vsyncpa [#allocation9], 1 }
 0x30c   :  { %644 = vsyncpa [#allocation12], 1 }
 0x30d   :  { %645 = vsyncpa [#allocation4], 1 }
 0x30e   :  { %647 = vsyncpa [#allocation4 + $0x1], 1 }

// kernel: tpu_custom_call.1
= control target key start
LH: loop header
LB: loop body
LE: loop exit
PB: predicated region body
PF: predicated region fallthrough
CT: control target
= control target key end

     0   :  { %s1454_s0 = inlined_call_operand.hbm [shape: f32[16,32], index: 0, kind: input, shape index: {}]   ;;  %s1455_s1 = inlined_call_operand.hbm [shape: f32[16,32], index: 1, kind: input, shape index: {}]   ;;  %s1456_s2 = inlined_call_operand.hbm [shape: bf16[32,64], index: 2, kind: input, shape index: {}]   ;;  %s1457_s3 = inlined_call_operand.hbm [shape: bf16[32,64], index: 3, kind: input, shape index: {}]   ;;  %s1458_s4 = inlined_call_operand.vmem [shape: f32[1,64], index: 4, kind: input, shape index: {}]   ;;  %s1459_s5 = inlined_call_operand.hbm [shape: bf16[32,64], index: 5, kind: input, shape index: {}]   ;;  %s1460_s6 = inlined_call_operand.hbm [shape: bf16[32,64], index: 6, kind: input, shape index: {}]   ;;  %s1461_s7 = inlined_call_operand.vmem [shape: f32[1,64], index: 7, kind: input, shape index: {}]   ;;  %s1462_s8 = inlined_call_operand.hbm [shape: f32[16,64], index: 8, kind: output, shape index: {}]  }
   0x1   :  { %1466 = sst [smem:[#allocation23_spill]] %s1456_s2 }
   0x2   :  { %1467 = sst [smem:[#allocation24_spill]] %s1457_s3 }
   0x3   :  { %1468 = sst [smem:[#allocation25_spill]] %s1459_s5 }
   0x4   :  { %1469 = sst [smem:[#allocation26_spill]] %s1460_s6 }
   0x5   :  { %13 = vsyncpa [#allocation3], 0 }
   0x6   :  { %15 = vsyncpa [#allocation3 + $0x1], 0 }
   0x7   :  { %16 = vsyncpa [#allocation6], 0 }
   0x8   :  { %18 = vsyncpa [#allocation6 + $0x1], 0 }
   0x9   :  { %19 = vsyncpa [#allocation9], 0 }
   0xa   :  { %20 = vsyncpa [#allocation12], 0 }
   0xb   :  { %21 = vsyncpa [#allocation4], 0 }
   0xc   :  { %23 = vsyncpa [#allocation4 + $0x1], 0  ;;  %s1240_s27 = smov 0   ;;  %s1242_s28 = smov 0  }
   0xd   :  { %s1244_s29 = smov 0   ;;  %s1246_s30 = smov 0  }
   0xe LB: > { %1470 = sst [smem:[#allocation20_spill]] %s1181_s29  ;;  %s1264_s12 = sadd.s32 4294967295, %s1185_s30   ;;  %s1185_s30 = sphi %s1246_s30, %s1485_s30   ;;  %s1181_s29 = sphi %s1244_s29, %s1487_s29   ;;  %s1177_s28 = sphi %s1242_s28, %s1489_s28   ;;  %s1173_s27 = sphi %s1240_s27, %s1488_s27  }
   0xf   : > { %s1471_s2 = sld [smem:[#allocation23_spill]]  ;;  %p751_p0 = scmp.ge.s32.totalorder %s1185_s30, 1 }
  0x10   : > { %p50_p1 = scmp.eq.s32.totalorder %s1264_s12, 0  ;;  %p238_p2 = scmp.lt.s32.totalorder %s1185_s30, 3 }
  0x11   : > { %s1187_s14 = smov [#allocation7]   ;;  %s1473_s3 = sld [smem:[#allocation24_spill]] }
  0x12   : > { %p1269_p3 = pnand %p751_p0, %p238_p2  ;;  %s251_s15 = sshll.u32 %s1187_s14, 4  ;;  %s252_s15 = int_to_ptr.vmem [resolvable:$true] %s251_s15 }
  0x13   : > { %s1475_s5 = sld [smem:[#allocation25_spill]]  ;;  %s1188_s23 = smov [#allocation8]  }
  0x14   : > { %p839_p4 = pneg %p1269_p3  ;;  %s265_s24 = sshll.u32 %s1188_s23, 4  ;;  %s266_s24 = int_to_ptr.vmem [resolvable:$true] %s265_s24 }
  0x15   : > { %s249_s11 = sshll.u32 %s1471_s2, 4  ;;  %s1189_s25 = smov 64   ;;  %s250_s11 = int_to_ptr.hbm [resolvable:$true] %s249_s11 }
  0x16   : > { %p1281_p6 = pnand %p839_p4, %p50_p1  ;;  %s1190_s26 = smov 4  }
  0x17   : > { %s263_s18 = sshll.u32 %s1473_s3, 4  ;;  %s1476_s6 = sld [smem:[#allocation26_spill]]  ;;  %s264_s18 = int_to_ptr.hbm [resolvable:$true] %s263_s18 }
  0x18   : > { %842 = dma.hbm_to_vmem [thread:$0]  (!%p1281_p6), %s250_s11, 256, %s252_s15, [#allocation6], %s1189_s25, %s1189_s25, %s1190_s26  }
  0x19   : > { %s280_s22 = sshll.u32 %s1475_s5, 4  ;;  %s1191_s16 = smov [#allocation10]   ;;  %s281_s22 = int_to_ptr.hbm [resolvable:$true] %s280_s22 }
  0x1a   : > { %845 = dma.hbm_to_vmem [thread:$0]  (!%p1281_p6), %s264_s18, 256, %s266_s24, [#allocation9], %s1189_s25, %s1189_s25, %s1190_s26  }
  0x1b   : > { %s282_s17 = sshll.u32 %s1191_s16, 4  ;;  %s1192_s11 = smov [#allocation11]   ;;  %s283_s17 = int_to_ptr.vmem [resolvable:$true] %s282_s17 }
  0x1c   : > { %848 = dma.hbm_to_vmem [thread:$0]  (!%p1281_p6), %s281_s22, 256, %s283_s17, [#allocation9], %s1189_s25, %s1189_s25, %s1190_s26  }
  0x1d   : > { %s294_s14 = sshll.u32 %s1476_s6, 4  ;;  %s296_s15 = sshll.u32 %s1192_s11, 4  ;;  %s295_s14 = int_to_ptr.hbm [resolvable:$true] %s294_s14  ;;  %s297_s15 = int_to_ptr.vmem [resolvable:$true] %s296_s15 }
  0x1e   : > { %851 = dma.hbm_to_vmem [thread:$0]  (!%p1281_p6), %s295_s14, 256, %s297_s15, [#allocation12], %s1189_s25, %s1189_s25, %s1190_s26  }
  0x1f   : > { %s750_s18 = sadd.s32 4294967294, %s1185_s30   ;;  %s1301_s20 = sadd.s32 1, %s1185_s30  }
  0x20   : > { %1477 = sst [smem:[#allocation21_spill]] %s1301_s20  ;;  %s33_s21 = ssub.s32 %s1185_s30, %s1301_s20 }
  0x21   : > { %s36_s23 = sadd.s32 1, %s1181_s29  ;;  %p34_p7 = scmp.eq.s32.totalorder %s33_s21, 0 }
  0x22   : > { %p43_p8 = scmp.ne.s32.totalorder %s1181_s29, %s1177_s28  ;;  %p44_p9 = scmp.eq.s32.totalorder %s1185_s30, 0 }
  0x23   : > { %p49_p10 = scmp.ne.s32.totalorder %s1177_s28, %s1173_s27  ;;  %p225_p13 = scmp.eq.s32.totalorder %s1264_s12, 1 }
  0x24   : > { %s1312_s22 = scalar_select %p34_p7, %s1181_s29, %s36_s23  }
  0x25   : > { %p1314_p11 = por %p44_p9, %p43_p8  ;;  %p1320_p12 = por %p50_p1, %p49_p10 }
  0x26   : > { %1478 = sst [smem:[#allocation22_spill]] %s1312_s22  ;;  %p231_p0 = scmp.eq.s32.totalorder %s750_s18, 1 }
  0x27   : > { %p867_p2 = scmp.lt.s32.totalorder %s1185_s30, 2  ;;  %s313_s25 = sand.u32 1, %s1181_s29  }
  0x28   : > { %p1327_p4 = por %p225_p13, %p43_p8  ;;  %p1331_p6 = por %p231_p0, %p49_p10 }
  0x29   : > { %s1335_s10 = sshll.u32 %s313_s25, 3  ;;  %s758_s14 = sshll.u32 %s1185_s30, 3 }
  0x2a   : > { %s321_s11 = scalar_lea.hbm %s1454_s0, %s758_s14  ;;  %s317_s15 = scalar_lea.vmem [#allocation2], %s1335_s10 }
  0x2b   : > { %s325_s18 = sshll.u32 %s317_s15, 4  ;;  %s323_s21 = sshll.u32 %s321_s11, 4  ;;  %s326_s18 = int_to_ptr.vmem [resolvable:$true] %s325_s18  ;;  %s324_s21 = int_to_ptr.hbm [resolvable:$true] %s323_s21 }
  0x2c   : > { %p1344_p7 = pnand %p867_p2, %p1314_p11  ;;  %s340_s5 = scalar_lea.hbm %s1455_s1, %s758_s14 }
  0x2d   : > { %s332_s6 = sand.u32 1, %s1185_s30   ;;  %s314_s22 = scalar_lea.sflag [#allocation3], %s313_s25 }
  0x2e   : > { %s1043_s16 = sshra.s32 %s324_s21, 4  ;;  %p1047_p9 = pneg %p1344_p7  ;;  %s1044_s16 = int_to_ptr.hbm [resolvable:$true] %s1043_s16 }
  0x2f   : > { %s1045_s17 = scalar_lea.hbm %s1044_s16, 8  ;;  %s1050_s15 = scalar_lea.hbm %s1454_s0, 16 }
  0x30   : > { %p1046_p8 = scmp.ne.s32.totalorder %s1044_s16, %s1045_s17  ;;  %p1051_p13 = scmp.lt.s32.totalorder %s1044_s16, %s1454_s0 }
  0x31   : > { %p1052_p0 = scmp.lt.s32.totalorder %s1050_s15, %s1045_s17 }
  0x32   : > { %p1048_p10 = pnand %p1047_p9, %p1046_p8 }
  0x33   : > { %p1053_p2 = por %p1052_p0, %p1051_p13 }
  0x34   : > { %p1049_p11 = pneg %p1048_p10 }
  0x36   : > { %p1054_p5 = pnand %p1053_p2, %p1049_p11 }
  0x38   : > { %1057 = shalt.err (!%p1054_p5)
}
  0x39   : > { %855 = dma.hbm_to_vmem [thread:$0]  (!%p1344_p7), %s324_s21, 128, %s326_s18, %s314_s22  }
  0x3a   : > { %s342_s25 = sshll.u32 %s340_s5, 4  ;;  %s336_s14 = scalar_lea.vmem [#allocation5], %s1335_s10  ;;  %s343_s25 = int_to_ptr.hbm [resolvable:$true] %s342_s25 }
  0x3b   : > { %s344_s29 = sshll.u32 %s336_s14, 4  ;;  %s333_s24 = scalar_lea.sflag [#allocation6], %s332_s6  ;;  %s345_s29 = int_to_ptr.vmem [resolvable:$true] %s344_s29 }
  0x3c   : > { %s1073_s11 = sshra.s32 %s343_s25, 4  ;;  %s1080_s15 = scalar_lea.hbm %s1455_s1, 16  ;;  %s1074_s11 = int_to_ptr.hbm [resolvable:$true] %s1073_s11 }
  0x3d   : > { %s1075_s20 = scalar_lea.hbm %s1074_s11, 8  ;;  %p1081_p5 = scmp.lt.s32.totalorder %s1074_s11, %s1455_s1 }
  0x3e   : > { %p1076_p8 = scmp.ne.s32.totalorder %s1074_s11, %s1075_s20  ;;  %p1082_p13 = scmp.lt.s32.totalorder %s1080_s15, %s1075_s20 }
  0x40   : > { %p1078_p10 = pnand %p1076_p8, %p1047_p9  ;;  %p1083_p0 = por %p1082_p13, %p1081_p5 }
  0x42   : > { %p1079_p11 = pneg %p1078_p10 }
  0x44   : > { %p1084_p2 = pnand %p1083_p0, %p1079_p11 }
  0x46   : > { %1087 = shalt.err (!%p1084_p2)
}
  0x47   : > { %858 = dma.hbm_to_vmem [thread:$0]  (!%p1344_p7), %s343_s25, 128, %s345_s29, %s333_s24  }
  0x48   : > { %353 = sbr.rel (%p1269_p3) target bundleno = 755 (0x2f3), region = 52  ;;  %s1380_s5 = sand.u32 (!%p1269_p3), 1, %s1177_s28  }
  0x49   : > { %s1383_s6 = sshll.u32 (!%p1269_p3), %s1380_s5, 3  ;;  %s356_s10 = scalar_lea.sflag (!%p1269_p3), [#allocation3], %s1380_s5 }
  0x4a   : > { %s359_s20 = scalar_lea.vmem (!%p1269_p3), [#allocation2], %s1383_s6 }
  0x4d   : > { %1148 = dma.done.wait (%p1320_p12), %s356_s10, 128  }
  0x4e   : > { %1150 = vsyncadd (%p1320_p12), %s356_s10, 4294967168  ;;  %s365_s29 = sand.u32 1, %s1264_s12   ;;  %s369_s18 = scalar_lea.vmem [#allocation5], %s1383_s6 }
  0x4f   : > { %s366_s13 = scalar_lea.sflag [#allocation6], %s365_s29 }
  0x50   : > { %1152 = dma.done.wait (%p1320_p12), %s366_s13, 128  }
  0x51   : > { %1154 = vsyncadd (%p1320_p12), %s366_s13, 4294967168 }
  0x52   : > { %1156 = dma.done.wait (%p50_p1), [#allocation6], 256  }
  0x53   : > { %1158 = vsyncadd (%p50_p1), [#allocation6], 4294967040 }
  0x54   : > { %1160 = dma.done.wait (%p50_p1), [#allocation9], 512  }
  0x55   : > { %1162 = vsyncadd (%p50_p1), [#allocation9], 4294966784 }
  0x56   : > { %1164 = dma.done.wait (%p50_p1), [#allocation12], 256  }
  0x57   : > { %1166 = vsyncadd (%p50_p1), [#allocation12], 4294967040  ;;  %v812_v0 = vld [vmem:[#allocation8 + $0x8] sm:$0xff]  ;;  %v810_v1 = vld [vmem:[#allocation7 + $0x8] sm:$0xff]  ;;  %vm453_vm0 = vcmask 261120   ;;  %s1193_s23 = smov 96  }
  0x58   : > { %v811_v2 = vld [vmem:[#allocation8] sm:$0xff]  ;;  %v809_v3 = vld [vmem:[#allocation7] sm:$0xff]  ;;  %463 = vmatpush.bf16.msra.mxu0 %v812_v0  ;;  %491 = vmatpush.bf16.msra.mxu1 %v810_v1  ;;  %v814_v8 = vld [vmem:[#allocation10 + $0x8] sm:$0xff]  ;;  %s427_s14 = scalar_lea.vmem [#allocation13], %s1383_s6  ;;  %s1194_s24 = smov 32   ;;  %vm601_vm1 = vcmask 523520  }
  0x59   : > { %v430_v4 = vld [vmem:[%s369_s18] sm:$0xff]  ;;  %v429_v5 = vld [vmem:[%s359_s20] sm:$0xff]  ;;  %573 = vmatpush.bf16.msra.mxu3 %v814_v8  ;;  %s806_s11 = sshll.u32 %s1264_s12, 3  ;;  %s616_s2 = sshll.u32 %s427_s14, 4  ;;  %s617_s2 = int_to_ptr.vmem [resolvable:$true] %s616_s2 }
  0x5a   : > { %v436_v6 = vpack.c.bf16 %v430_v4, %v430_v4  ;;  %v431_v7 = vpack.c.bf16 %v429_v5, %v429_v5  ;;  %v813_v9 = vld [vmem:[#allocation10] sm:$0xff]  ;;  %v816_v10 = vld [vmem:[#allocation11 + $0x8] sm:$0xff]  ;;  %v815_v25 = vld [vmem:[#allocation11] sm:$0xff]  ;;  %s614_s15 = scalar_lea.hbm %s1462_s8, %s806_s11  ;;  %s604_s6 = scalar_lea.sflag [#allocation4], %s1380_s5 }
  0x5b   : > { %v913_v11 = vld [vmem:[%s1458_s4] ss:$0 sm:$0xff]  ;;  %545 = vmatpush.bf16.msra.mxu2 %v816_v10  ;;  %s618_s22 = sshll.u32 %s614_s15, 4  ;;  %s1123_s13 = scalar_lea.hbm %s1462_s8, 16  ;;  %s619_s22 = int_to_ptr.hbm [resolvable:$true] %s618_s22 }
  0x5c   : > { %464 = vmatpush.bf16.msra.mxu0 %v811_v2  ;;  %492 = vmatpush.bf16.msra.mxu1 %v809_v3  ;;  %v914_v31 = vld [vmem:[%s1461_s7] ss:$0 sm:$0xff]  ;;  %s1117_s10 = sshra.s32 %s619_s22, 4  ;;  %s1118_s10 = int_to_ptr.hbm [resolvable:$true] %s1117_s10 }
  0x5d   : > { %574 = vmatpush.bf16.msra.mxu3 %v813_v9  ;;  %s1119_s20 = scalar_lea.hbm %s1118_s10, 8  ;;  %p1124_p7 = scmp.lt.s32.totalorder %s1118_s10, %s1462_s8 }
  0x5e   : > { %p1120_p1 = scmp.ne.s32.totalorder %s1118_s10, %s1119_s20  ;;  %p1125_p9 = scmp.lt.s32.totalorder %s1123_s13, %s1119_s20 }
  0x5f   : > { %777 = vmatmul.msk.bf16.vlgmr.msra.gmra.mxu0 %vm453_vm0, %v436_v6  ;;  %786 = vmatmul.msk.bf16.vlgmr.msra.gmra.mxu1 %vm453_vm0, %v431_v7 }
  0x60   : > { %546 = vmatpush.bf16.msra.mxu2 %v815_v25  ;;  %p1121_p3 = pnand %p1120_p1, %p1327_p4  ;;  %p1126_p8 = por %p1125_p9, %p1124_p7 }
  0x62   : > { %p1122_p12 = pneg %p1121_p3 }
  0x64   : > { %p1127_p10 = pnand %p1126_p8, %p1122_p12 }
  0xdc   : > { %v466_v12 = vpop.f32.mrf.mxu0  ;;  %v494_v13 = vpop.f32.mrf.mxu1 }
  0xdd   : > { %v495_v14 = vadd.f32 %v494_v13, %v466_v12 }
  0xdf   : > { %v502_v15 = vadd.f32 %v913_v11, %v495_v14 }
  0xe1   : > { %v503_v16 = vsub.f32 0.0, %v502_v15 }
  0xe3   : > { %v504_v17 = vmul.f32 1.442695, %v503_v16 }
  0xe4   : > { %v468_v18 = vpop.f32.mrf.mxu0  ;;  %v496_v19 = vpop.f32.mrf.mxu1 }
  0xe5   : > { %915 = vpow2.f32 %v504_v17 }
  0xeb   : > { %v916_v20 = vpop.eup %915 }
  0xec   : > { %v506_v21 = vadd.f32 1.0, %v916_v20 }
  0xee   : > { %917 = vrcp.f32 %v506_v21 }
  0xf4   : > { %v918_v22 = vpop.eup %917 }
  0xf5   : > { %510 = vrot.lane.b32.xlu0 %v918_v22, %s1193_s23  ;;  %v508_v23 = vmul.f32 %v918_v22, %v429_v5 }
  0xf7   : > { %v514_v24 = vpack.c.bf16 %v508_v23, %v508_v23 }
  0xf9   : > { %804 = vmatmul.msk.bf16.vlgmr.msra.gmra.mxu3 %vm453_vm0, %v514_v24 }
 0x167   : > { %v511_v26 = vpop.permute.xlu0 %510 }
 0x168   : > { %v513_v27 = vmul.f32 %v511_v26, %v430_v4 }
 0x16a   : > { %v519_v28 = vpack.c.bf16 %v513_v27, %v513_v27 }
 0x16c   : > { %795 = vmatmul.msk.bf16.vlgmr.msra.gmra.mxu2 %vm453_vm0, %v519_v28 }
 0x17c   : > { %v576_v29 = vpop.f32.mrf.mxu3 }
 0x184   : > { %v578_v30 = vpop.f32.mrf.mxu3 }
 0x1ef   : > { %v548_v32 = vpop.f32.mrf.mxu2 }
 0x1f0   : > { %v577_v33 = vadd.f32 %v576_v29, %v548_v32 }
 0x1f2   : > { %v584_v34 = vadd.f32 %v914_v31, %v577_v33 }
 0x1f4   : > { %v585_v35 = vsub.f32 0.0, %v584_v34 }
 0x1f6   : > { %v586_v36 = vmul.f32 1.442695, %v585_v35 }
 0x1f7   : > { %v550_v37 = vpop.f32.mrf.mxu2 }
 0x1f8   : > { %919 = vpow2.f32 %v586_v36 }
 0x1fe   : > { %v920_v38 = vpop.eup %919 }
 0x1ff   : > { %v588_v39 = vadd.f32 1.0, %v920_v38 }
 0x201   : > { %921 = vrcp.f32 %v588_v39 }
 0x207   : > { %v922_v40 = vpop.eup %921 }
 0x208   : > { %v590_v41 = vmul.f32 %v922_v40, %v508_v23  ;;  %593 = vrot.lane.b32.xlu0 %v922_v40, %s1193_s23 }
 0x20a   : > { %591 = vst.msk [vmem:[%s427_s14] sm:$0xff] %vm453_vm0, %v590_v41 }
 0x27a   : > { %v594_v42 = vpop.permute.xlu0 %593 }
 0x27b   : > { %v596_v43 = vmul.f32 %v594_v42, %v513_v27 }
 0x27d   : > { %598 = vrot.lane.b32.xlu1 %v596_v43, %s1194_s24 }
 0x2ef   : > { %v599_v44 = vpop.permute.xlu1 %598 }
 0x2f0   : > { %602 = vst.msk [vmem:[%s427_s14] sm:$0xff] %vm601_vm1, %v599_v44 }
 0x2f1   : > { %1130 = shalt.err (!%p1127_p10)
}
 0x2f2   : > { %837 = dma.vmem_to_hbm [thread:$0]  (%p1327_p4), %s617_s2, 128, %s619_s22, %s604_s6  }
 0x2f3 PF: > { %s630_s5 = sand.u32 1, %s1173_s27   ;;  %p1484_p11 = scmp.ge.s32.totalorder %s1185_s30, 2 }
 0x2f4   : > { %s631_s21 = scalar_lea.sflag [#allocation4], %s630_s5 }
 0x2f5   : > { %p860_p5 = pnand %p1484_p11, %p1331_p6 }
 0x2f7   : > { %p861_p13 = pneg %p860_p5 }
 0x2f9   : > { %1168 = dma.done.wait (%p861_p13), %s631_s21, 128  }
 0x2fa   : > { %1170 = vsyncadd (%p861_p13), %s631_s21, 4294967168  ;;  %s1485_s30 = sld [smem:[#allocation21_spill]]  ;;  %s1488_s27 = smov %s1177_s28 }
 0x2fb   : > { %s1486_s23 = sld [smem:[#allocation20_spill]] }
 0x2fc   : > { %s1487_s29 = sld [smem:[#allocation22_spill]] }
 0x300   : > { %p26_p0 = scmp.ge.s32.totalorder %s1485_s30, 4  }
 0x301   : > { %s1489_s28 = smov %s1486_s23 }
 0x302   :  { %28 = sbr.rel (!%p26_p0) target bundleno = 14 (0xe), region = 126 }
 0x307   :  { %637 = vsyncpa [#allocation3], 1 }
 0x308   :  { %639 = vsyncpa [#allocation3 + $0x1], 1 }
 0x309   :  { %640 = vsyncpa [#allocation6], 1 }
 0x30a   :  { %642 = vsyncpa [#allocation6 + $0x1], 1 }
 0x30b   :  { %643 = vsyncpa [#allocation9], 1 }
 0x30c   :  { %644 = vsyncpa [#allocation12], 1 }
 0x30d   :  { %645 = vsyncpa [#allocation4], 1 }
 0x30e   :  { %647 = vsyncpa [#allocation4 + $0x1], 1 }

</bundles_post_ra>
